<compile_context>
chip_gen: v7x
topology: tpu7x:2x2x1
jax: 0.10.0
libtpu: 0.0.40
codegen_flags: <defaults>
</compile_context>

<pallas_src>
import jax
import jax.numpy as jnp
from jax.experimental import pallas as pl
from jax.experimental.pallas import tpu as pltpu

LANE = 128            # pad output features to a full lane width -> unmasked stores
MAX_SINGLE_TILE = 512 # batches up to this size run as one grid-less tile
BATCH_TILE = 512      # batch tile for the gridded (large-batch) path


def _net_kernel(x_ref, w1_ref, b1_ref, w2_ref, b2_ref, o_ref):
    # Hidden layer: x @ W1 + b1 -> ReLU   (MXU matmul, VPU add/max)
    h = jnp.dot(x_ref[...], w1_ref[...], preferred_element_type=jnp.float32)
    h = jnp.maximum(h + b1_ref[...], 0.0)           # b1 is (1, H), broadcasts over rows
    # Output layer: h @ W2 + b2  (W2/b2 zero-padded to a lane-dense width)
    q = jnp.dot(h, w2_ref[...], preferred_element_type=jnp.float32)
    o_ref[...] = (q + b2_ref[...]).astype(o_ref.dtype)


def net_forward(x, w1, b1, w2, b2):
    """x: (B, F), w1: (F, H), b1: (H,), w2: (H, O), b2: (O,) -> (B, O)."""
    B, F = x.shape
    H = w1.shape[1]
    O = w2.shape[1]

    # Lane-dense output: pad O up to a multiple of 128 with zero columns.
    O_pad = ((O + LANE - 1) // LANE) * LANE
    w2_p = jnp.zeros((H, O_pad), w2.dtype).at[:, :O].set(w2)
    b2_p = jnp.zeros((1, O_pad), b2.dtype).at[:, :O].set(b2.reshape(1, O))
    b1_2d = b1.reshape(1, H)

    cost = pl.CostEstimate(
        flops=2 * B * (F * H + H * O_pad),
        transcendentals=0,
        bytes_accessed=4 * (B * F + F * H + H + H * O_pad + O_pad + B * O_pad),
    )

    if B <= MAX_SINGLE_TILE:
        # ---- Small-batch path: no grid, whole arrays resident in VMEM. ----
        out_p = pl.pallas_call(
            _net_kernel,
            out_shape=jax.ShapeDtypeStruct((B, O_pad), x.dtype),
            in_specs=[pl.BlockSpec(memory_space=pltpu.MemorySpace.VMEM)] * 5,
            out_specs=pl.BlockSpec(memory_space=pltpu.MemorySpace.VMEM),
            cost_estimate=cost,
        )(x, w1, b1_2d, w2_p, b2_p)
        return out_p[:, :O]

    # ---- Large-batch path: grid over batch, weights held resident. ----
    tile_b = BATCH_TILE
    B_pad = ((B + tile_b - 1) // tile_b) * tile_b
    if B_pad != B:
        x = jnp.zeros((B_pad, F), x.dtype).at[:B].set(x)

    out_p = pl.pallas_call(
        _net_kernel,
        out_shape=jax.ShapeDtypeStruct((B_pad, O_pad), x.dtype),
        grid=(B_pad // tile_b,),
        in_specs=[
            pl.BlockSpec((tile_b, F), lambda i: (i, 0)),   # x: tiled over batch
            pl.BlockSpec((F, H), lambda i: (0, 0)),        # W1: resident
            pl.BlockSpec((1, H), lambda i: (0, 0)),        # b1: resident
            pl.BlockSpec((H, O_pad), lambda i: (0, 0)),    # W2 (padded): resident
            pl.BlockSpec((1, O_pad), lambda i: (0, 0)),    # b2 (padded): resident
        ],
        out_specs=pl.BlockSpec((tile_b, O_pad), lambda i: (i, 0)),
        compiler_params=pltpu.CompilerParams(
            dimension_semantics=("parallel",),             # shard tiles across TCs (v7x)
            vmem_limit_bytes=64 * 1024 * 1024,             # fits v7x's 64 MiB VMEM
        ),
        cost_estimate=cost,
    )(x, w1, b1_2d, w2_p, b2_p)
    return out_p[:B, :O]


def init_params(key, n_feature, n_hidden, n_output):
    """Deterministic synthetic parameters (PyTorch nn.Linear-like uniform init)."""
    k1, k2, k3, k4 = jax.random.split(key, 4)
    bound1 = 1.0 / jnp.sqrt(n_feature)
    bound2 = 1.0 / jnp.sqrt(n_hidden)
    # Stored as (in, out) so the kernel computes x @ W directly (== x @ W_torch.T).
    w1 = jax.random.uniform(k1, (n_feature, n_hidden), jnp.float32, -bound1, bound1)
    b1 = jax.random.uniform(k2, (n_hidden,), jnp.float32, -bound1, bound1)
    w2 = jax.random.uniform(k3, (n_hidden, n_output), jnp.float32, -bound2, bound2)
    b2 = jax.random.uniform(k4, (n_output,), jnp.float32, -bound2, bound2)
    return w1, b1, w2, b2


def _reference(x, w1, b1, w2, b2):
    return jnp.maximum(x @ w1 + b1, 0.0) @ w2 + b2


if __name__ == "__main__":
    # Small shapes consistent with a DQN Net: batch=8, n_feature=4, n_hidden=32, n_output=3
    batch, n_feature, n_hidden, n_output = 8, 4, 32, 3

    key = jax.random.PRNGKey(0)
    kx, kp, kb = jax.random.split(key, 3)
    x = jax.random.normal(kx, (batch, n_feature), jnp.float32)
    w1, b1, w2, b2 = init_params(kp, n_feature, n_hidden, n_output)

    # Small-batch (grid-less) path
    out = jax.block_until_ready(net_forward(x, w1, b1, w2, b2))
    ref = _reference(x, w1, b1, w2, b2)
    assert out.shape == (batch, n_output)
    assert jnp.allclose(out, ref, atol=1e-5, rtol=1e-5)

    # Large-batch (gridded, weights-resident) path — DQN replay-batch style
    xb = jax.random.normal(kb, (1024, n_feature), jnp.float32)
    outb = jax.block_until_ready(net_forward(xb, w1, b1, w2, b2))
    refb = _reference(xb, w1, b1, w2, b2)
    assert outb.shape == (1024, n_output)
    assert jnp.allclose(outb, refb, atol=1e-5, rtol=1e-5)

    print("KERNEL_OK")
</pallas_src>

<mosaic_0001>
module attributes {stable_mosaic.version = 11 : i64} {
  func.func @_net_kernel(%arg0: memref<8x4xf32, #tpu.memory_space<vmem>>, %arg1: memref<4x32xf32, #tpu.memory_space<vmem>>, %arg2: memref<1x32xf32, #tpu.memory_space<vmem>>, %arg3: memref<32x128xf32, #tpu.memory_space<vmem>>, %arg4: memref<1x128xf32, #tpu.memory_space<vmem>>, %arg5: memref<8x128xf32, #tpu.memory_space<vmem>>) attributes {dimension_semantics = [], scalar_prefetch = 0 : i64, scratch_operands = 0 : i64, tpu.core_type = #tpu.core_type<tc>} {
    %c0 = arith.constant 0 : index
    %c0_0 = arith.constant 0 : index
    %0 = vector.load %arg0[%c0, %c0_0] : memref<8x4xf32, #tpu.memory_space<vmem>>, vector<8x4xf32>
    %c0_1 = arith.constant 0 : index
    %c0_2 = arith.constant 0 : index
    %1 = vector.load %arg1[%c0_1, %c0_2] : memref<4x32xf32, #tpu.memory_space<vmem>>, vector<4x32xf32>
    %cst = arith.constant dense<0.000000e+00> : vector<8x32xf32>
    %2 = tpu.matmul %0, %1, %cst {dimension_numbers = #tpu.dot_dimension_numbers<[1], [0], [0], [1], [0, 0, 1, 1], [], []>} : vector<8x4xf32>, vector<4x32xf32>, vector<8x32xf32> -> vector<8x32xf32>
    %c0_3 = arith.constant 0 : index
    %c0_4 = arith.constant 0 : index
    %3 = vector.load %arg2[%c0_3, %c0_4] : memref<1x32xf32, #tpu.memory_space<vmem>>, vector<1x32xf32>
    %4 = vector.broadcast %3 : vector<1x32xf32> to vector<8x32xf32>
    %5 = arith.addf %2, %4 : vector<8x32xf32>
    %cst_5 = arith.constant 0.000000e+00 : f32
    %6 = vector.broadcast %cst_5 : f32 to vector<8x32xf32>
    %7 = arith.maximumf %5, %6 : vector<8x32xf32>
    %c0_6 = arith.constant 0 : index
    %c0_7 = arith.constant 0 : index
    %8 = vector.load %arg3[%c0_6, %c0_7] : memref<32x128xf32, #tpu.memory_space<vmem>>, vector<32x128xf32>
    %cst_8 = arith.constant dense<0.000000e+00> : vector<8x128xf32>
    %9 = tpu.matmul %7, %8, %cst_8 {dimension_numbers = #tpu.dot_dimension_numbers<[1], [0], [0], [1], [0, 0, 1, 1], [], []>} : vector<8x32xf32>, vector<32x128xf32>, vector<8x128xf32> -> vector<8x128xf32>
    %c0_9 = arith.constant 0 : index
    %c0_10 = arith.constant 0 : index
    %10 = vector.load %arg4[%c0_9, %c0_10] : memref<1x128xf32, #tpu.memory_space<vmem>>, vector<1x128xf32>
    %11 = vector.broadcast %10 : vector<1x128xf32> to vector<8x128xf32>
    %12 = arith.addf %9, %11 : vector<8x128xf32>
    %c0_11 = arith.constant 0 : index
    %c0_12 = arith.constant 0 : index
    %13 = vector.load %arg5[%c0_11, %c0_12] : memref<8x128xf32, #tpu.memory_space<vmem>>, vector<8x128xf32>
    tpu.vector_store %arg5[%c0_11, %c0_12], %12 {strides = array<i32>} : memref<8x128xf32, #tpu.memory_space<vmem>>, vector<8x128xf32>,
    return
  }
}

</mosaic_0001>

<bundles_post_ra>
// kernel: tpu_custom_call.1
= control target key start
LH: loop header
LB: loop body
LE: loop exit
PB: predicated region body
PF: predicated region fallthrough
CT: control target
= control target key end

     0   :  { %10 = vsyncpa [#allocation3], 0  ;;  %s386_s0 = inlined_call_operand.vmem [shape: f32[8,4], index: 0, kind: input, shape index: {}]   ;;  %s387_s1 = inlined_call_operand.vmem [shape: f32[4,32], index: 1, kind: input, shape index: {}]   ;;  %s388_s2 = inlined_call_operand.vmem [shape: f32[1,32], index: 2, kind: input, shape index: {}]   ;;  %s389_s3 = inlined_call_operand.hbm [shape: f32[32,128], index: 3, kind: input, shape index: {}]   ;;  %s390_s4 = inlined_call_operand.vmem [shape: f32[1,128], index: 4, kind: input, shape index: {}]   ;;  %s391_s5 = inlined_call_operand.hbm [shape: f32[8,128], index: 5, kind: output, shape index: {}]  }
   0x1   :  { %11 = vsyncpa [#allocation4], 0  ;;  %s313_s18 = smov [#allocation2]   ;;  %s265_s22 = scalar_lea.hbm %s389_s3, 512 }
   0x2   :  { %s23_s19 = sshll.u32 %s313_s18, 4  ;;  %p266_p0 = scmp.ne.s32.totalorder %s389_s3, %s265_s22  ;;  %s24_s19 = int_to_ptr.vmem [resolvable:$true] %s23_s19 }
   0x3   :  { %p269_p1 = scmp.lt.u32.totalorder %s265_s22, %s389_s3 }
   0x5   :  { %p271_p2 = pnand %p269_p1, %p266_p0 }
   0x7   :  { %274 = shalt.err (!%p271_p2)
}
   0x8   :  { %s275_s27 = scalar_lea.vmem %s24_s19, 512  ;;  %p280_p4 = scmp.lt.s32.totalorder %s24_s19, %s24_s19 }
   0x9   :  { %p276_p3 = scmp.ne.s32.totalorder %s24_s19, %s275_s27  ;;  %p281_p5 = scmp.lt.s32.totalorder %s275_s27, %s275_s27 }
   0xb   :  { %p282_p6 = por %p281_p5, %p280_p4 }
   0xd   :  { %p283_p7 = pnand %p282_p6, %p276_p3 }
   0xf   :  { %286 = shalt.err (!%p283_p7)
}
  0x10   :  { %s314_s28 = smov 128   ;;  %s315_s29 = smov 8  }
  0x11   :  { %29 = dma.hbm_to_vmem [thread:$0]  %s389_s3, 512, %s24_s19, [#allocation3], %s314_s28, %s314_s28, %s315_s29  }
  0x12   :  { %309 = dma.done.wait [#allocation3], 512  }
  0x13   :  { %310 = vsyncadd [#allocation3], 4294966784  ;;  %v316_v0 = vmov 0.0   ;;  %vm317_vm0 = vmmov 0   ;;  %v318_v1 = vmov 0.0|0.0   ;;  %vm48_vm1 = vcmask 1043456  }
  0x14   :  { %236 = vmatprep.subr.mxu0 %v316_v0  ;;  %238 = vmatprep.mubr.msk.f32.mxu0 %vm317_vm0, %v316_v0  ;;  %vm44_vm2 = vcmask 31744   ;;  %v36_v2 = vld [vmem:[%s387_s1] sm:$0xf]  ;;  %v124_v5 = vld [vmem:[#allocation2 + $0x8] sm:$0xff]  ;;  %v125_v7 = vld [vmem:[#allocation2 + $0x10] sm:$0xff]  ;;  %vm134_vm3 = vcmask 261120  }
  0x15   :  { %252 = vmatprep.subr.bf16.mxu1 %v318_v1  ;;  %249 = vmatprep.mubr.msk.f32.mxu1 %vm317_vm0, %v316_v0  ;;  %v35_v3 = vld [vmem:[%s386_s0] sm:$0xff]  ;;  %v126_v8 = vld [vmem:[#allocation2 + $0x18] sm:$0xff]  ;;  %s319_s12 = smov [#allocation5]  }
  0x16   :  { %v123_v4 = vld [vmem:[#allocation2] sm:$0xff]  ;;  %237 = vmatpush3.msk.msra.mxu0 %vm48_vm1, %v36_v2  ;;  %v256_v9 = vpack.c.bf16 %v126_v8, %v125_v7  ;;  %s215_s13 = sshll.u32 %s319_s12, 4  ;;  %s216_s13 = int_to_ptr.vmem [resolvable:$true] %s215_s13 }
  0x17   :  { %239 = vmatmul.mubr.msk.f32.vlgmr.msra.gmra.mrb[0].mxu0 %vm44_vm2, %v35_v3  ;;  %v253_v6 = vpack.c.bf16 %v124_v5, %v123_v4  ;;  %v224_v10 = vld [vmem:[%s388_s2] ss:$0 sm:$0xff]  ;;  %s287_s14 = scalar_lea.vmem %s216_s13, 128  ;;  %p292_p9 = scmp.lt.s32.totalorder %s216_s13, %s216_s13 }
  0x18   :  { %v227_v15 = vld [vmem:[%s390_s4] ss:$0 sm:$0xff]  ;;  %p288_p8 = scmp.ne.s32.totalorder %s216_s13, %s287_s14  ;;  %p293_p10 = scmp.lt.s32.totalorder %s287_s14, %s287_s14 }
  0x19   :  { %254 = vmatpush3.bf16.msra.mxu1 %v253_v6 }
  0x1a   :  { %255 = vmatprep.subr.bf16.mxu1 %v318_v1  ;;  %p294_p11 = por %p293_p10, %p292_p9 }
  0x1c   :  { %p295_p12 = pnand %p294_p11, %p288_p8 }
  0x1d   :  { %257 = vmatpush3.bf16.msra.mxu1 %v256_v9 }
  0xea   :  { %v118_v11 = vpop.f32.mrb[0].mxu0 }
  0xeb   :  { %v119_v12 = vadd.f32 %v224_v10, %v118_v11  ;;  %v240_v13 = vpop.f32.mrb[1].mxu0 }
  0xed   :  { %v122_v14 = vmax.f32 %v119_v12, 0.0 }
  0xef   :  { %250 = vmatmul.mubr.msk.f32.vlgmr.msra.gmra.mrb[0].mxu1 %vm134_vm3, %v122_v14 }
 0x1c2   :  { %v204_v16 = vpop.f32.mrb[0].mxu1 }
 0x1c3   :  { %v205_v17 = vadd.f32 %v227_v15, %v204_v16  ;;  %v251_v18 = vpop.f32.mrb[1].mxu1 }
 0x1c5   :  { %208 = vst [vmem:[#allocation5] sm:$0xff] %v205_v17 }
 0x1c6   :  { %298 = shalt.err (!%p295_p12)
}
 0x1c7   :  { %s299_s16 = scalar_lea.hbm %s391_s5, 128 }
 0x1c8   :  { %p300_p13 = scmp.ne.s32.totalorder %s391_s5, %s299_s16  ;;  %p303_p0 = scmp.lt.u32.totalorder %s299_s16, %s391_s5 }
 0x1ca   :  { %p305_p1 = pnand %p303_p0, %p300_p13 }
 0x1cc   :  { %308 = shalt.err (!%p305_p1)
}
 0x1cd   :  { %218 = dma.vmem_to_hbm [thread:$0]  %s216_s13, 128, %s391_s5, [#allocation4]  }
 0x1ce   :  { %311 = dma.done.wait [#allocation4], 128  }
 0x1cf   :  { %312 = vsyncadd [#allocation4], 4294967168 }
 0x1d0   :  { %222 = vsyncpa [#allocation3], 1 }
 0x1d1   :  { %223 = vsyncpa [#allocation4], 1 }

</bundles_post_ra>
